<compile_context>
chip_gen: v7x
topology: tpu7x:2x2x1
jax: 0.10.0
libtpu: 0.0.40
codegen_flags: <defaults>
</compile_context>

<pallas_src>
import functools

import jax
import jax.numpy as jnp
from jax.experimental import pallas as pl
from jax.experimental.pallas import tpu as pltpu


def _round_up(x: int, m: int) -> int:
    return (x + m - 1) // m * m


def _cdiv(a: int, b: int) -> int:
    return -(-a // b)


def _mlp_kernel(x_ref, w1_ref, b1_ref, w2_ref, b2_ref, *out_refs, emit_q: bool):
    if emit_q:
        q_ref, act_ref = out_refs
    else:
        (act_ref,) = out_refs

    # In-kernel bf16 cast of the activations (VPU; input stays f32/bf16 in HBM).
    x = x_ref[...].astype(jnp.bfloat16)

    # Layer 1: bf16 MXU matmul with f32 accumulation; bias + ReLU on the VPU.
    h = jnp.dot(x, w1_ref[...], preferred_element_type=jnp.float32)
    h = jnp.maximum(h + b1_ref[...], 0.0)

    # Layer 2: cast h back to bf16 for the MXU, accumulate in f32.
    q = jnp.dot(h.astype(jnp.bfloat16), w2_ref[...],
                preferred_element_type=jnp.float32)
    q = q + b2_ref[...]

    if emit_q:
        q_ref[...] = q.astype(q_ref.dtype)

    # Fused greedy argmax (get_action). Tie-break = lowest index, matching
    # jnp.argmax. No lane masking needed: out_dim is unpadded.
    col = jax.lax.broadcasted_iota(jnp.int32, q.shape, 1)
    q_max = jnp.max(q, axis=-1, keepdims=True)
    sentinel = jnp.full(col.shape, q.shape[-1], jnp.int32)
    action = jnp.min(jnp.where(q >= q_max, col, sentinel),
                     axis=-1, keepdims=True)
    act_ref[...] = action


def prepare_params(w1, b1, w2, b2):
    """One-time weight prep: bf16 cast + zero-pad hidden dim to a multiple of
    128 (lane-dense h / K-dim). Call once; reuse the result every step."""
    in_dim, hidden = w1.shape
    out_dim = w2.shape[1]
    hid_p = _round_up(hidden, 128)

    w1p = jnp.zeros((in_dim, hid_p), jnp.bfloat16)
    w1p = w1p.at[:, :hidden].set(w1.astype(jnp.bfloat16))
    b1p = jnp.zeros((1, hid_p), jnp.float32)
    b1p = b1p.at[:, :hidden].set(b1.astype(jnp.float32).reshape(1, hidden))
    w2p = jnp.zeros((hid_p, out_dim), jnp.bfloat16)
    w2p = w2p.at[:hidden, :].set(w2.astype(jnp.bfloat16))
    b2p = b2.astype(jnp.float32).reshape(1, out_dim)
    return w1p, b1p, w2p, b2p, (in_dim, hidden, out_dim)


def agent_model_forward(x, params, *, block_batch: int = 1024,
                        return_q: bool = True, q_dtype=jnp.bfloat16):
    """Fused 2-layer MLP forward.

    Returns (q_values [B, out], greedy_action [B] int32) if return_q,
    else just greedy_action (get_action fast path, no Q writeback).
    """
    w1p, b1p, w2p, b2p, (in_dim, hidden, out_dim) = params
    batch = x.shape[0]
    hid_p = w1p.shape[1]
    assert x.shape == (batch, in_dim)
    assert w1p.shape == (in_dim, hid_p) and b1p.shape == (1, hid_p)
    assert w2p.shape == (hid_p, out_dim) and b2p.shape == (1, out_dim)

    # --- batch tiling: no wrapper-side padding of x; masked final tile ------
    num_tiles = max(1, _cdiv(batch, block_batch))
    if batch >= 32:
        num_tiles = max(num_tiles, 2)   # give v7x's 2nd TensorCore work
    tb = _round_up(_cdiv(batch, num_tiles), 16)
    if tb >= batch:
        tb = batch                      # single full-batch block, always legal
    grid = (_cdiv(batch, tb),)

    # --- VMEM budget (double-buffered activation tiles + resident weights) --
    x_bytes = jnp.dtype(x.dtype).itemsize
    q_bytes = jnp.dtype(q_dtype).itemsize if return_q else 0
    weight_bytes = (in_dim * hid_p * 2 + hid_p * 4
                    + hid_p * out_dim * 2 + out_dim * 4)
    vmem_bytes = (
        2 * tb * in_dim * x_bytes        # x tile, double-buffered
        + 2 * tb * out_dim * q_bytes     # q tile, double-buffered (if emitted)
        + 2 * tb * 4                     # action tile, int32, double-buffered
        + 2 * weight_bytes               # resident weights (2 pipeline bufs)
        + 4 * tb * hid_p * 4             # f32 intermediate headroom
    )
    vmem_limit = int(min(max(2 * vmem_bytes, 4 << 20), 32 << 20))

    cost = pl.CostEstimate(
        flops=2 * batch * (in_dim * hid_p + hid_p * out_dim),
        transcendentals=0,
        bytes_accessed=(batch * in_dim * x_bytes + weight_bytes
                        + batch * out_dim * q_bytes + batch * 4),
    )

    kernel = functools.partial(_mlp_kernel, emit_q=return_q)

    act_spec = pl.BlockSpec((tb, 1), lambda i: (i, 0))
    act_shape = jax.ShapeDtypeStruct((batch, 1), jnp.int32)
    if return_q:
        out_shape = (jax.ShapeDtypeStruct((batch, out_dim), q_dtype), act_shape)
        out_specs = (pl.BlockSpec((tb, out_dim), lambda i: (i, 0)), act_spec)
    else:
        out_shape = act_shape
        out_specs = act_spec

    result = pl.pallas_call(
        kernel,
        out_shape=out_shape,
        grid=grid,
        in_specs=[
            pl.BlockSpec((tb, in_dim), lambda i: (i, 0)),     # x: per-tile
            pl.BlockSpec((in_dim, hid_p), lambda i: (0, 0)),  # w1: resident
            pl.BlockSpec((1, hid_p), lambda i: (0, 0)),       # b1: resident
            pl.BlockSpec((hid_p, out_dim), lambda i: (0, 0)),  # w2: resident
            pl.BlockSpec((1, out_dim), lambda i: (0, 0)),     # b2: resident
        ],
        out_specs=out_specs,
        compiler_params=pltpu.CompilerParams(
            dimension_semantics=("parallel",),   # shards batch on v7x 2 TCs
            vmem_limit_bytes=vmem_limit,
        ),
        cost_estimate=cost,
    )(x, w1p, b1p, w2p, b2p)

    if return_q:
        q, act = result
        return q, act[:, 0]
    return result[:, 0]


def init_params(key, input_size, hidden_size, output_size):
    """Deterministic parameter init (nn.Linear-style fan-in uniform)."""
    k1, k2, k3, k4 = jax.random.split(key, 4)
    s1 = 1.0 / jnp.sqrt(input_size)
    s2 = 1.0 / jnp.sqrt(hidden_size)
    w1 = jax.random.uniform(k1, (input_size, hidden_size), jnp.float32, -s1, s1)
    b1 = jax.random.uniform(k2, (1, hidden_size), jnp.float32, -s1, s1)
    w2 = jax.random.uniform(k3, (hidden_size, output_size), jnp.float32, -s2, s2)
    b2 = jax.random.uniform(k4, (1, output_size), jnp.float32, -s2, s2)
    return w1, b1, w2, b2


def reference_forward(x, w1, b1, w2, b2):
    h = jnp.maximum(x @ w1 + b1, 0.0)
    return h @ w2 + b2


if __name__ == "__main__":
    # Small shapes consistent with the module's (input_size, output_size) API.
    # batch=88 exercises the multi-tile grid (tb=48 -> 2 steps) including a
    # Pallas-masked partial final tile (rows 88..95 discarded by design).
    batch, input_size, hidden_size, output_size = 88, 32, 64, 16

    key = jax.random.PRNGKey(0)
    kx, kp = jax.random.split(key)
    x = jax.random.normal(kx, (batch, input_size), jnp.float32)
    w1, b1, w2, b2 = init_params(kp, input_size, hidden_size, output_size)

    # One-time weight prep (hoisted out of the per-call path).
    params = prepare_params(w1, b1, w2, b2)
    ref = reference_forward(x, w1, b1, w2, b2)

    # 1) f32-Q path: exact argmax consistency + tolerance check vs reference.
    q32, act = agent_model_forward(x, params, q_dtype=jnp.float32)
    q32, act = jax.block_until_ready((q32, act))
    assert q32.shape == (batch, output_size) and q32.dtype == jnp.float32
    assert act.shape == (batch,) and act.dtype == jnp.int32
    # bf16 operands with f32 accumulation -> relaxed tolerance.
    assert jnp.allclose(q32, ref, atol=3e-2, rtol=3e-2)
    # Fused get_action must agree with argmax over the kernel's own Q-values.
    assert jnp.array_equal(act, jnp.argmax(q32, axis=-1).astype(jnp.int32))

    # 2) default serving path: bf16 Q writeback (half the HBM write traffic).
    qbf, act_bf = agent_model_forward(x, params)
    qbf, act_bf = jax.block_until_ready((qbf, act_bf))
    assert qbf.dtype == jnp.bfloat16 and qbf.shape == (batch, output_size)
    assert jnp.allclose(qbf.astype(jnp.float32), ref, atol=6e-2, rtol=6e-2)
    assert jnp.array_equal(act_bf, act)   # argmax taken from in-register f32 q

    # 3) get_action fast path: no Q output at all.
    act_only = agent_model_forward(x, params, return_q=False)
    act_only = jax.block_until_ready(act_only)
    assert jnp.array_equal(act_only, act)

    # TODO(synk): checkpoint I/O, holographic (uint8) quantization transfer,
    # and ModelInfo/metadata bookkeeping from AgentModel are host-side
    # utilities with no kernel equivalent and are intentionally not implemented.

    print("KERNEL_OK")
</pallas_src>

<mosaic_0001>
module attributes {stable_mosaic.version = 11 : i64} {
  func.func @_mlp_kernel(%arg0: i32, %arg1: memref<48x32xf32, #tpu.memory_space<vmem>>, %arg2: memref<32x128xbf16, #tpu.memory_space<vmem>>, %arg3: memref<1x128xf32, #tpu.memory_space<vmem>>, %arg4: memref<128x16xbf16, #tpu.memory_space<vmem>>, %arg5: memref<1x16xf32, #tpu.memory_space<vmem>>, %arg6: memref<48x16xf32, #tpu.memory_space<vmem>>, %arg7: memref<48x1xi32, #tpu.memory_space<vmem>>) attributes {dimension_semantics = [#tpu.dimension_semantics<parallel>], iteration_bounds = array<i64: 2>, scalar_prefetch = 0 : i64, scratch_operands = 0 : i64, tpu.core_type = #tpu.core_type<tc>, window_params = [{transform_indices = @transform_0, window_bounds = array<i64: 48, 32>}, {pipeline_mode = #tpu.pipeline_mode<synchronous>, transform_indices = @transform_1, window_bounds = array<i64: 32, 128>}, {pipeline_mode = #tpu.pipeline_mode<synchronous>, transform_indices = @transform_2, window_bounds = array<i64: 1, 128>}, {pipeline_mode = #tpu.pipeline_mode<synchronous>, transform_indices = @transform_3, window_bounds = array<i64: 128, 16>}, {pipeline_mode = #tpu.pipeline_mode<synchronous>, transform_indices = @transform_4, window_bounds = array<i64: 1, 16>}, {transform_indices = @transform_5, window_bounds = array<i64: 48, 16>}, {transform_indices = @transform_6, window_bounds = array<i64: 48, 1>}]} {
    %c0 = arith.constant 0 : index
    %c0_0 = arith.constant 0 : index
    %0 = vector.load %arg1[%c0, %c0_0] : memref<48x32xf32, #tpu.memory_space<vmem>>, vector<48x32xf32>
    %1 = arith.truncf %0 : vector<48x32xf32> to vector<48x32xbf16>
    %c0_1 = arith.constant 0 : index
    %c0_2 = arith.constant 0 : index
    %2 = vector.load %arg2[%c0_1, %c0_2] : memref<32x128xbf16, #tpu.memory_space<vmem>>, vector<32x128xbf16>
    %cst = arith.constant dense<0.000000e+00> : vector<48x128xf32>
    %3 = tpu.matmul %1, %2, %cst {dimension_numbers = #tpu.dot_dimension_numbers<[1], [0], [0], [1], [0, 0, 1, 1], [], []>} : vector<48x32xbf16>, vector<32x128xbf16>, vector<48x128xf32> -> vector<48x128xf32>
    %c0_3 = arith.constant 0 : index
    %c0_4 = arith.constant 0 : index
    %4 = vector.load %arg3[%c0_3, %c0_4] : memref<1x128xf32, #tpu.memory_space<vmem>>, vector<1x128xf32>
    %5 = vector.broadcast %4 : vector<1x128xf32> to vector<48x128xf32>
    %6 = arith.addf %3, %5 : vector<48x128xf32>
    %cst_5 = arith.constant 0.000000e+00 : f32
    %7 = vector.broadcast %cst_5 : f32 to vector<48x128xf32>
    %8 = arith.maximumf %6, %7 : vector<48x128xf32>
    %9 = arith.truncf %8 : vector<48x128xf32> to vector<48x128xbf16>
    %c0_6 = arith.constant 0 : index
    %c0_7 = arith.constant 0 : index
    %10 = vector.load %arg4[%c0_6, %c0_7] : memref<128x16xbf16, #tpu.memory_space<vmem>>, vector<128x16xbf16>
    %cst_8 = arith.constant dense<0.000000e+00> : vector<48x16xf32>
    %11 = tpu.matmul %9, %10, %cst_8 {dimension_numbers = #tpu.dot_dimension_numbers<[1], [0], [0], [1], [0, 0, 1, 1], [], []>} : vector<48x128xbf16>, vector<128x16xbf16>, vector<48x16xf32> -> vector<48x16xf32>
    %c0_9 = arith.constant 0 : index
    %c0_10 = arith.constant 0 : index
    %12 = vector.load %arg5[%c0_9, %c0_10] : memref<1x16xf32, #tpu.memory_space<vmem>>, vector<1x16xf32>
    %13 = vector.broadcast %12 : vector<1x16xf32> to vector<48x16xf32>
    %14 = arith.addf %11, %13 : vector<48x16xf32>
    %c0_11 = arith.constant 0 : index
    %c0_12 = arith.constant 0 : index
    %15 = vector.load %arg6[%c0_11, %c0_12] : memref<48x16xf32, #tpu.memory_space<vmem>>, vector<48x16xf32>
    tpu.vector_store %arg6[%c0_11, %c0_12], %14 {strides = array<i32>} : memref<48x16xf32, #tpu.memory_space<vmem>>, vector<48x16xf32>,
    %16 = tpu.iota {dimensions = array<i32: 1>} : vector<48x16xi32>
    %cst_13 = arith.constant dense<0xFF800000> : vector<48xf32>
    %17 = vector.multi_reduction <maximumf>, %14, %cst_13 [1] : vector<48x16xf32> to vector<48xf32>
    %18 = vector.shape_cast %17 : vector<48xf32> to vector<48x1xf32>
    %c16_i32 = arith.constant 16 : i32
    %19 = vector.broadcast %c16_i32 : i32 to vector<48x16xi32>
    %20 = vector.broadcast %18 : vector<48x1xf32> to vector<48x16xf32>
    %21 = arith.cmpf oge, %14, %20 : vector<48x16xf32>
    %22 = arith.select %21, %16, %19 : vector<48x16xi1>, vector<48x16xi32>
    %cst_14 = arith.constant dense<2147483647> : vector<48xi32>
    %23 = vector.multi_reduction <minsi>, %22, %cst_14 [1] : vector<48x16xi32> to vector<48xi32>
    %24 = vector.shape_cast %23 : vector<48xi32> to vector<48x1xi32>
    %c0_15 = arith.constant 0 : index
    %c0_16 = arith.constant 0 : index
    %25 = vector.load %arg7[%c0_15, %c0_16] : memref<48x1xi32, #tpu.memory_space<vmem>>, vector<48x1xi32>
    tpu.vector_store %arg7[%c0_15, %c0_16], %24 {strides = array<i32>} : memref<48x1xi32, #tpu.memory_space<vmem>>, vector<48x1xi32>,
    return
  }
  func.func @transform_0(%arg0: i32) -> (i32, i32) {
    %c0_i32 = arith.constant 0 : i32
    %c0_i32_0 = arith.constant 0 : i32
    return %arg0, %c0_i32 : i32, i32
  }
  func.func @transform_1(%arg0: i32) -> (i32, i32) {
    %c0_i32 = arith.constant 0 : i32
    %c0_i32_0 = arith.constant 0 : i32
    %c0_i32_1 = arith.constant 0 : i32
    return %c0_i32, %c0_i32_0 : i32, i32
  }
  func.func @transform_2(%arg0: i32) -> (i32, i32) {
    %c0_i32 = arith.constant 0 : i32
    %c0_i32_0 = arith.constant 0 : i32
    %c0_i32_1 = arith.constant 0 : i32
    return %c0_i32, %c0_i32_0 : i32, i32
  }
  func.func @transform_3(%arg0: i32) -> (i32, i32) {
    %c0_i32 = arith.constant 0 : i32
    %c0_i32_0 = arith.constant 0 : i32
    %c0_i32_1 = arith.constant 0 : i32
    return %c0_i32, %c0_i32_0 : i32, i32
  }
  func.func @transform_4(%arg0: i32) -> (i32, i32) {
    %c0_i32 = arith.constant 0 : i32
    %c0_i32_0 = arith.constant 0 : i32
    %c0_i32_1 = arith.constant 0 : i32
    return %c0_i32, %c0_i32_0 : i32, i32
  }
  func.func @transform_5(%arg0: i32) -> (i32, i32) {
    %c0_i32 = arith.constant 0 : i32
    %c0_i32_0 = arith.constant 0 : i32
    return %arg0, %c0_i32 : i32, i32
  }
  func.func @transform_6(%arg0: i32) -> (i32, i32) {
    %c0_i32 = arith.constant 0 : i32
    %c0_i32_0 = arith.constant 0 : i32
    return %arg0, %c0_i32 : i32, i32
  }
}

</mosaic_0001>

<bundles_post_ra>
// kernel: tpu_custom_call.1
= control target key start
LH: loop header
LB: loop body
LE: loop exit
PB: predicated region body
PF: predicated region fallthrough
CT: control target
= control target key end

     0   :  { %s1593_s21 = smov 0   ;;  %s1595_s22 = smov 0   ;;  %s1846_s0 = inlined_call_operand.vmem [shape: f32[88,32], index: 0, kind: input, shape index: {}]   ;;  %s1847_s1 = inlined_call_operand.vmem [shape: bf16[32,128], index: 1, kind: input, shape index: {}]   ;;  %s1848_s2 = inlined_call_operand.vmem [shape: f32[1,128], index: 2, kind: input, shape index: {}]   ;;  %s1849_s3 = inlined_call_operand.vmem [shape: bf16[128,16], index: 3, kind: input, shape index: {}]   ;;  %s1850_s4 = inlined_call_operand.vmem [shape: f32[1,16], index: 4, kind: input, shape index: {}]   ;;  %s1851_s5 = inlined_call_operand.vmem [shape: f32[88,16], index: 5, kind: output, shape index: {0}]   ;;  %s1852_s6 = inlined_call_operand.vmem [shape: s32[88,1], index: 6, kind: output, shape index: {1}]  }
   0x1   :  { %s1597_s23 = smov 0  }
   0x2 LB: > { %s1606_s24 = sadd.s32 4294967295, %s1490_s23   ;;  %s1608_s25 = sadd.s32 1, %s1490_s23   ;;  %s1490_s23 = sphi %s1597_s23, %s1862_s23   ;;  %s1486_s22 = sphi %s1595_s22, %s1861_s22   ;;  %s1482_s21 = sphi %s1593_s21, %s1860_s21  }
   0x3   : > { %s131_s26 = ssub.s32 %s1490_s23, %s1608_s25  ;;  %s134_s27 = sadd.s32 1, %s1486_s22 }
   0x4   : > { %p132_p0 = scmp.eq.s32.totalorder %s131_s26, 0  ;;  %p144_p1 = scmp.ne.s32.totalorder %s1486_s22, %s1482_s21 }
   0x5   : > { %p145_p2 = scmp.eq.s32.totalorder %s1606_s24, 1  ;;  %p1112_p3 = scmp.ge.s32.totalorder %s1490_s23, 1 }
   0x6   : > { %s1616_s28 = scalar_select %p132_p0, %s1486_s22, %s134_s27  }
   0x7   : > { %p1618_p4 = por %p145_p2, %p144_p1  ;;  %p224_p5 = scmp.lt.s32.totalorder %s1490_s23, 3 }
   0x9   : > { %p225_p6 = pnand %p1112_p3, %p224_p5 }
   0xa   : > { %v1386_v0 = vld [vmem:[%s1847_s1] sm:$0xff] (!%p225_p6)   ;;  %v1556_v1 = vmov (!%p225_p6), 0.0   ;;  %v1387_v2 = vld [vmem:[%s1847_s1 + $0x8] sm:$0xff] (!%p225_p6)   ;;  %vm1557_vm0 = vmmov (!%p225_p6), 0   ;;  %s1633_s10 = smul.u32 (!%p225_p6), 6, %s1606_s24  ;;  %vm318_vm1 = vcmask (!%p225_p6), 261120  }
   0xb   : > { %228 = sbr.rel (%p225_p6) target bundleno = 1047 (0x417), region = 40  ;;  %1169 = vmatprep.subr.bf16.mxu0 (!%p225_p6), %v1556_v1  ;;  %1213 = vmatprep.subr.bf16.mxu1 (!%p225_p6), %v1556_v1  ;;  %v1388_v3 = vld [vmem:[%s1849_s3] sm:$0xff] (!%p225_p6)   ;;  %v1389_v4 = vld [vmem:[%s1849_s3 + $0x8] sm:$0xff] (!%p225_p6)   ;;  %v1390_v8 = vld [vmem:[%s1849_s3 + $0x10] sm:$0xff] (!%p225_p6)   ;;  %s252_s17 = sand.u32 (!%p225_p6), 1, %s1482_s21   ;;  %vm522_vm2 = vcmask (!%p225_p6), 130048  }
   0xc   : > { %1170 = vmatpush3.bf16.msra.mxu0 (!%p225_p6), %v1386_v0  ;;  %1173 = vmatprep.mubr.msk.bf16.mxu0 (!%p225_p6), %vm1557_vm0, %v1556_v1  ;;  %p266_p7 = scmp.lt.s32.totalorder (!%p225_p6), %s1633_s10, 10  ;;  %v1391_v11 = vld [vmem:[%s1849_s3 + $0x18] sm:$0xff] (!%p225_p6)   ;;  %v1392_v13 = vld [vmem:[%s1849_s3 + $0x20] sm:$0xff] (!%p225_p6)   ;;  %v1393_v16 = vld [vmem:[%s1849_s3 + $0x28] sm:$0xff] (!%p225_p6)   ;;  %s1697_s18 = smul.u32 (!%p225_p6), 48, %s252_s17  ;;  %vm651_vm15 = vcmask (!%p225_p6), 7168  }
   0xd   : > { %1171 = vmatprep.subr.bf16.mxu0 (!%p225_p6), %v1556_v1  ;;  %1205 = vmatprep.mubr.msk.bf16.mxu1 (!%p225_p6), %vm1557_vm0, %v1556_v1  ;;  %v1394_v18 = vld [vmem:[%s1849_s3 + $0x30] sm:$0xff] (!%p225_p6)   ;;  %v1395_v19 = vld [vmem:[%s1849_s3 + $0x38] sm:$0xff] (!%p225_p6)   ;;  %v1114_v20 = vld [vmem:[%s1848_s2] ss:$0 sm:$0xff] (!%p225_p6) }
   0xe   : > { %1221 = vmatpush3.bf16.msra.mxu1 (!%p225_p6), %v1388_v3  ;;  %v1120_v48 = vld [vmem:[%s1850_s4] ss:$0 sm:$0xff] (!%p225_p6)  ;;  %s1703_s23 = scalar_lea.vmem (!%p225_p6), [#allocation2], %s1697_s18   ;;  %s1730_s21 = scalar_lea.vmem (!%p225_p6), [#allocation3], %s1697_s18  }
   0xf   : > { %1214 = vmatprep.subr.bf16.mxu1 (!%p225_p6), %v1556_v1 }
  0x10   : > { %1172 = vmatpush3.bf16.msra.mxu0 (!%p225_p6), %v1387_v2 }
  0x11   : > { %1185 = vmatprep.subr.bf16.mxu0 (!%p225_p6), %v1556_v1 }
  0x12   : > { %s267_s13 = scalar_select %p266_p7, %s1633_s10, 10  ;;  %1222 = vmatpush3.bf16.msra.mxu1 %v1389_v4 }
  0x13   : > { %1215 = vmatprep.subr.bf16.mxu1 %v1556_v1  ;;  %s670_s26 = ssub.s32 (%p1618_p4), 11, %s1633_s10  ;;  %s1151_s27 = smul.u32 (%p1618_p4), 48, %s1606_s24 }
  0x14   : > { %s1113_s16 = sshll.u32 %s267_s13, 3  ;;  %p671_p8 = scmp.lt.s32.totalorder (%p1618_p4), %s670_s26, 6 }
  0x15   : > { %s269_s19 = scalar_lea.vmem %s1846_s0, %s1113_s16  ;;  %s1751_s8 = scalar_lea.vmem (%p1618_p4), %s1851_s5, %s1151_s27  }
  0x16   : > { %v286_v5 = vld [vmem:[%s269_s19] sm:$0xff]  ;;  %v287_v6 = vld [vmem:[%s269_s19 + $0x8] sm:$0xff]  ;;  %1223 = vmatpush3.bf16.msra.mxu1 %v1390_v8  ;;  %v288_v9 = vld [vmem:[%s269_s19 + $0x10] sm:$0xff] }
  0x17   : > { %v292_v7 = vpack.c.bf16 %v287_v6, %v286_v5  ;;  %v289_v10 = vld [vmem:[%s269_s19 + $0x18] sm:$0xff]  ;;  %1216 = vmatprep.subr.bf16.mxu1 %v1556_v1  ;;  %v290_v14 = vld [vmem:[%s269_s19 + $0x20] sm:$0xff]  ;;  %v291_v15 = vld [vmem:[%s269_s19 + $0x28] sm:$0xff] }
  0x18   : > { %v293_v12 = vpack.c.bf16 %v289_v10, %v288_v9  ;;  %v294_v17 = vpack.c.bf16 %v291_v15, %v290_v14  ;;  %v529_v9 = vlaneseq }
  0x19   : > { %1174 = vmatmul.mubr.msk.bf16.vlgmr.msra.gmra.mrb[0].mxu0 %vm318_vm1, %v292_v7 }
  0x1a   : > { %1177 = vmatprep.mubr.msk.bf16.mxu0 %vm1557_vm0, %v1556_v1  ;;  %1186 = vmatpush3.bf16.msra.mxu0 %v1388_v3  ;;  %v530_v10 = vand.u32 127, %v529_v9 }
  0x1b   : > { %1187 = vmatprep.subr.bf16.mxu0 %v1556_v1  ;;  %1224 = vmatpush3.bf16.msra.mxu1 %v1391_v11 }
  0x1c   : > { %1217 = vmatprep.subr.bf16.mxu1 %v1556_v1 }
  0x1e   : > { %1188 = vmatpush3.bf16.msra.mxu0 %v1389_v4 }
  0x1f   : > { %1189 = vmatprep.subr.bf16.mxu0 %v1556_v1  ;;  %1225 = vmatpush3.bf16.msra.mxu1 %v1392_v13 }
  0x20   : > { %1218 = vmatprep.subr.bf16.mxu1 %v1556_v1 }
  0x21   : > { %1178 = vmatmul.mubr.msk.bf16.gmra.mrb[4].mxu0 %vm318_vm1, %v293_v12 }
  0x22   : > { %1181 = vmatprep.mubr.msk.bf16.mxu0 %vm1557_vm0, %v1556_v1  ;;  %1190 = vmatpush3.bf16.msra.mxu0 %v1390_v8 }
  0x23   : > { %1191 = vmatprep.subr.bf16.mxu0 %v1556_v1  ;;  %1226 = vmatpush3.bf16.msra.mxu1 %v1393_v16 }
  0x24   : > { %1219 = vmatprep.subr.bf16.mxu1 %v1556_v1 }
  0x26   : > { %1192 = vmatpush3.bf16.msra.mxu0 %v1391_v11 }
  0x27   : > { %1193 = vmatprep.subr.bf16.mxu0 %v1556_v1  ;;  %1227 = vmatpush3.bf16.msra.mxu1 %v1394_v18 }
  0x28   : > { %1220 = vmatprep.subr.bf16.mxu1 %v1556_v1 }
  0x29   : > { %1182 = vmatmul.mubr.msk.bf16.gmra.mrb[8].mxu0 %vm318_vm1, %v294_v17 }
  0x2a   : > { %1194 = vmatpush3.bf16.msra.mxu0 %v1392_v13  ;;  %1201 = vmatprep.mubr.msk.bf16.mxu0 %vm1557_vm0, %v1556_v1 }
  0x2b   : > { %1195 = vmatprep.subr.bf16.mxu0 %v1556_v1  ;;  %1228 = vmatpush3.bf16.msra.mxu1 %v1395_v19 }
  0x2e   : > { %1196 = vmatpush3.bf16.msra.mxu0 %v1393_v16 }
  0x2f   : > { %1197 = vmatprep.subr.bf16.mxu0 %v1556_v1 }
  0x32   : > { %1198 = vmatpush3.bf16.msra.mxu0 %v1394_v18 }
  0x33   : > { %1199 = vmatprep.subr.bf16.mxu0 %v1556_v1 }
  0x36   : > { %1200 = vmatpush3.bf16.msra.mxu0 %v1395_v19 }
  0xec   : > { %v362_v21 = vpop.f32.mrb[0].mxu0 }
  0xed   : > { %v363_v22 = vadd.f32 %v1114_v20, %v362_v21  ;;  %v1175_v23 = vpop.f32.mrb[1].mxu0 }
  0xee   : > { %v365_v24 = vpop.f32.mrb[2].mxu0 }
  0xef   : > { %v366_v25 = vadd.f32 %v1114_v20, %v365_v24  ;;  %v1176_v26 = vpop.f32.mrb[3].mxu0  ;;  %v385_v27 = vmax.f32 %v363_v22, 0.0 }
  0xf1   : > { %v386_v28 = vmax.f32 %v366_v25, 0.0 }
  0xf3   : > { %v391_v29 = vpack.c.bf16 %v386_v28, %v385_v27 }
  0xf4   : > { %v370_v30 = vpop.f32.mrb[4].mxu0 }
  0xf5   : > { %v371_v31 = vadd.f32 %v1114_v20, %v370_v30  ;;  %v1179_v32 = vpop.f32.mrb[5].mxu0  ;;  %1202 = vmatmul.mubr.bf16.vlgmr.msra.gmra.mrb[12].mxu0 %v391_v29 }
  0xf6   : > { %v373_v33 = vpop.f32.mrb[6].mxu0 }
  0xf7   : > { %v374_v34 = vadd.f32 %v1114_v20, %v373_v33  ;;  %v1180_v35 = vpop.f32.mrb[7].mxu0  ;;  %v387_v36 = vmax.f32 %v371_v31, 0.0 }
  0xf9   : > { %v388_v37 = vmax.f32 %v374_v34, 0.0 }
  0xfb   : > { %v392_v38 = vpack.c.bf16 %v388_v37, %v387_v36 }
  0xfc   : > { %v378_v39 = vpop.f32.mrb[8].mxu0 }
  0xfd   : > { %v379_v40 = vadd.f32 %v1114_v20, %v378_v39  ;;  %v1183_v41 = vpop.f32.mrb[9].mxu0  ;;  %1206 = vmatmul.mubr.bf16.vlgmr.msra.gmra.mrb[0].mxu1 %v392_v38 }
  0xfe   : > { %v381_v42 = vpop.f32.mrb[10].mxu0  ;;  %1209 = vmatprep.mubr.msk.bf16.mxu1 %vm1557_vm0, %v1556_v1 }
  0xff   : > { %v382_v43 = vadd.f32 %v1114_v20, %v381_v42  ;;  %v1184_v44 = vpop.f32.mrb[11].mxu0  ;;  %v389_v45 = vmax.f32 %v379_v40, 0.0 }
 0x101   : > { %v390_v46 = vmax.f32 %v382_v43, 0.0 }
 0x103   : > { %v393_v47 = vpack.c.bf16 %v390_v46, %v389_v45 }
 0x105   : > { %1210 = vmatmul.mubr.bf16.gmra.mrb[4].mxu1 %v393_v47 }
 0x1c8   : > { %v499_v49 = vpop.f32.mrb[12].mxu0 }
 0x1c9   : > { %v500_v50 = vadd.f32 %v1120_v48, %v499_v49  ;;  %v1203_v51 = vpop.f32.mrb[13].mxu0 }
 0x1ca   : > { %v502_v52 = vpop.f32.mrb[14].mxu0 }
 0x1cb   : > { %523 = vst.msk [vmem:[%s1703_s23] sm:$0xff] %vm522_vm2, %v500_v50  ;;  %v503_v53 = vadd.f32 %v1120_v48, %v502_v52  ;;  %v1204_v54 = vpop.f32.mrb[15].mxu0  ;;  %v531_v55 = vsel %vm522_vm2, %v500_v50, -inf }
 0x1cc   : > { %532 = vmax.xlane.f32.xlu0 %v531_v55 }
 0x1cd   : > { %524 = vst.msk [vmem:[%s1703_s23 + $0x8] sm:$0xff] %vm522_vm2, %v503_v53  ;;  %v534_v56 = vsel %vm522_vm2, %v503_v53, -inf }
 0x1d0   : > { %v507_v57 = vpop.f32.mrb[0].mxu1  ;;  %535 = vmax.xlane.f32.xlu0 %v534_v56 }
 0x1d1   : > { %v508_v58 = vadd.f32 %v1120_v48, %v507_v57  ;;  %v1207_v59 = vpop.f32.mrb[1].mxu1 }
 0x1d2   : > { %v510_v60 = vpop.f32.mrb[2].mxu1 }
 0x1d3   : > { %525 = vst.msk [vmem:[%s1703_s23 + $0x10] sm:$0xff] %vm522_vm2, %v508_v58  ;;  %v511_v61 = vadd.f32 %v1120_v48, %v510_v60  ;;  %v1208_v62 = vpop.f32.mrb[3].mxu1  ;;  %v537_v63 = vsel %vm522_vm2, %v508_v58, -inf }
 0x1d4   : > { %538 = vmax.xlane.f32.xlu1 %v537_v63 }
 0x1d5   : > { %526 = vst.msk [vmem:[%s1703_s23 + $0x18] sm:$0xff] %vm522_vm2, %v511_v61  ;;  %v540_v0 = vsel %vm522_vm2, %v511_v61, -inf }
 0x1d8   : > { %541 = vmax.xlane.f32.xlu1 %v540_v0  ;;  %v515_v1 = vpop.f32.mrb[4].mxu1 }
 0x1d9   : > { %v516_v2 = vadd.f32 %v1120_v48, %v515_v1  ;;  %v1211_v3 = vpop.f32.mrb[5].mxu1 }
 0x1da   : > { %v518_v4 = vpop.f32.mrb[6].mxu1 }
 0x1db   : > { %527 = vst.msk [vmem:[%s1703_s23 + $0x20] sm:$0xff] %vm522_vm2, %v516_v2  ;;  %v519_v5 = vadd.f32 %v1120_v48, %v518_v4  ;;  %v1212_v6 = vpop.f32.mrb[7].mxu1  ;;  %v543_v7 = vsel %vm522_vm2, %v516_v2, -inf }
 0x1dc   : > { %544 = vmax.xlane.f32.xlu0 %v543_v7 }
 0x1dd   : > { %528 = vst.msk [vmem:[%s1703_s23 + $0x28] sm:$0xff] %vm522_vm2, %v519_v5  ;;  %v546_v8 = vsel %vm522_vm2, %v519_v5, -inf }
 0x1de   : > { %547 = vmax.xlane.f32.xlu1 %v546_v8 }
 0x259   : > { %v533_v11 = vpop.xlane.xlu0 %532 }
 0x25a   : > { %vm549_vm3 = vcmp.ge.f32.partialorder %v500_v50, %v533_v11 }
 0x25b   : > { %v555_v12 = vsel %vm549_vm3, %v530_v10, 16 }
 0x25c   : > { %v561_v13 = vsel %vm522_vm2, %v555_v12, 2147483647 }
 0x25d   : > { %v536_v14 = vpop.xlane.xlu0 %535  ;;  %v563_v15 = vshra.s32 %v561_v13, 16  ;;  %v562_v41 = vand.u32 65535, %v561_v13 }
 0x25e   : > { %vm550_vm4 = vcmp.ge.f32.partialorder %v503_v53, %v536_v14 }
 0x25f   : > { %v556_v16 = vsel %vm550_vm4, %v530_v10, 16  ;;  %v565_v17 = vcvt.s32.f32 %v563_v15  ;;  %v564_v43 = vcvt.s32.f32 %v562_v41 }
 0x260   : > { %v576_v18 = vsel %vm522_vm2, %v556_v16, 2147483647 }
 0x261   : > { %v539_v19 = vpop.xlane.xlu1 %538  ;;  %566 = vmin.xlane.f32.xlu0 %v565_v17  ;;  %v578_v20 = vshra.s32 %v576_v18, 16  ;;  %v577_v44 = vand.u32 65535, %v576_v18 }
 0x262   : > { %vm551_vm5 = vcmp.ge.f32.partialorder %v508_v58, %v539_v19 }
 0x263   : > { %v557_v21 = vsel %vm551_vm5, %v530_v10, 16  ;;  %v580_v22 = vcvt.s32.f32 %v578_v20  ;;  %v579_v47 = vcvt.s32.f32 %v577_v44 }
 0x264   : > { %v591_v23 = vsel %vm522_vm2, %v557_v21, 2147483647 }
 0x265   : > { %v542_v24 = vpop.xlane.xlu1 %541  ;;  %581 = vmin.xlane.f32.xlu1 %v580_v22  ;;  %v593_v25 = vshra.s32 %v591_v23, 16  ;;  %v592_v48 = vand.u32 65535, %v591_v23 }
 0x266   : > { %vm552_vm6 = vcmp.ge.f32.partialorder %v511_v61, %v542_v24 }
 0x267   : > { %v558_v26 = vsel %vm552_vm6, %v530_v10, 16  ;;  %v595_v27 = vcvt.s32.f32 %v593_v25  ;;  %v594_v51 = vcvt.s32.f32 %v592_v48 }
 0x268   : > { %v606_v28 = vsel %vm522_vm2, %v558_v26, 2147483647 }
 0x269   : > { %596 = vmin.xlane.f32.xlu0 %v595_v27  ;;  %v545_v29 = vpop.xlane.xlu0 %544  ;;  %v608_v30 = vshra.s32 %v606_v28, 16  ;;  %v607_v52 = vand.u32 65535, %v606_v28 }
 0x26a   : > { %vm553_vm7 = vcmp.ge.f32.partialorder %v516_v2, %v545_v29 }
 0x26b   : > { %v559_v31 = vsel %vm553_vm7, %v530_v10, 16  ;;  %v548_v32 = vpop.xlane.xlu1 %547  ;;  %v610_v33 = vcvt.s32.f32 %v608_v30  ;;  %v609_v55 = vcvt.s32.f32 %v607_v52 }
 0x26c   : > { %v621_v34 = vsel %vm522_vm2, %v559_v31, 2147483647  ;;  %vm554_vm8 = vcmp.ge.f32.partialorder %v519_v5, %v548_v32 }
 0x26d   : > { %v560_v35 = vsel %vm554_vm8, %v530_v10, 16  ;;  %611 = vmin.xlane.f32.xlu1 %v610_v33  ;;  %v623_v36 = vshra.s32 %v621_v34, 16  ;;  %v622_v56 = vand.u32 65535, %v621_v34 }
 0x26e   : > { %v636_v37 = vsel %vm522_vm2, %v560_v35, 2147483647 }
 0x26f   : > { %v625_v38 = vcvt.s32.f32 %v623_v36  ;;  %v638_v39 = vshra.s32 %v636_v37, 16  ;;  %v637_v58 = vand.u32 65535, %v636_v37  ;;  %v624_v60 = vcvt.s32.f32 %v622_v56 }
 0x271   : > { %626 = vmin.xlane.f32.xlu0 %v625_v38  ;;  %v640_v40 = vcvt.s32.f32 %v638_v39  ;;  %v639_v63 = vcvt.s32.f32 %v637_v58 }
 0x273   : > { %641 = vmin.xlane.f32.xlu1 %v640_v40 }
 0x2ee   : > { %v567_v42 = vpop.xlane.xlu0 %566 }
 0x2ef   : > { %vm568_vm9 = vcmp.eq.f32.partialorder %v565_v17, %v567_v42  ;;  %v573_v1 = vcvt.f32.s32 %v567_v42 }
 0x2f0   : > { %v569_v45 = vsel %vm568_vm9, %v564_v43, inf }
 0x2f1   : > { %570 = vmin.xlane.f32.xlu0 %v569_v45  ;;  %v574_v3 = vshll.u32 %v573_v1, 16 }
 0x2f2   : > { %v582_v46 = vpop.xlane.xlu1 %581 }
 0x2f3   : > { %vm583_vm10 = vcmp.eq.f32.partialorder %v580_v22, %v582_v46  ;;  %v588_v4 = vcvt.f32.s32 %v582_v46 }
 0x2f4   : > { %v584_v49 = vsel %vm583_vm10, %v579_v47, inf }
 0x2f5   : > { %585 = vmin.xlane.f32.xlu1 %v584_v49  ;;  %v589_v8 = vshll.u32 %v588_v4, 16 }
 0x2f6   : > { %v597_v50 = vpop.xlane.xlu0 %596 }
 0x2f7   : > { %vm598_vm11 = vcmp.eq.f32.partialorder %v595_v27, %v597_v50  ;;  %v603_v9 = vcvt.f32.s32 %v597_v50 }
 0x2f8   : > { %v599_v53 = vsel %vm598_vm11, %v594_v51, inf }
 0x2f9   : > { %600 = vmin.xlane.f32.xlu0 %v599_v53  ;;  %v604_v13 = vshll.u32 %v603_v9, 16 }
 0x2fa   : > { %v612_v54 = vpop.xlane.xlu1 %611 }
 0x2fb   : > { %vm613_vm12 = vcmp.eq.f32.partialorder %v610_v33, %v612_v54  ;;  %v618_v14 = vcvt.f32.s32 %v612_v54 }
 0x2fc   : > { %v614_v57 = vsel %vm613_vm12, %v609_v55, inf }
 0x2fd   : > { %615 = vmin.xlane.f32.xlu1 %v614_v57  ;;  %v619_v18 = vshll.u32 %v618_v14, 16 }
 0x2fe   : > { %v627_v59 = vpop.xlane.xlu0 %626 }
 0x2ff   : > { %vm628_vm13 = vcmp.eq.f32.partialorder %v625_v38, %v627_v59  ;;  %v633_v19 = vcvt.f32.s32 %v627_v59 }
 0x300   : > { %v642_v61 = vpop.xlane.xlu1 %641  ;;  %v629_v62 = vsel %vm628_vm13, %v624_v60, inf }
 0x301   : > { %630 = vmin.xlane.f32.xlu0 %v629_v62  ;;  %vm643_vm14 = vcmp.eq.f32.partialorder %v640_v40, %v642_v61  ;;  %v648_v21 = vcvt.f32.s32 %v642_v61  ;;  %v634_v24 = vshll.u32 %v633_v19, 16 }
 0x302   : > { %v644_v0 = vsel %vm643_vm14, %v639_v63, inf }
 0x303   : > { %645 = vmin.xlane.f32.xlu1 %v644_v0  ;;  %v649_v27 = vshll.u32 %v648_v21, 16 }
 0x37e   : > { %v571_v2 = vpop.xlane.xlu0 %570 }
 0x37f   : > { %v572_v5 = vcvt.f32.s32 %v571_v2 }
 0x381   : > { %v575_v6 = vadd.s32 %v574_v3, %v572_v5 }
 0x382   : > { %v586_v7 = vpop.xlane.xlu1 %585 }
 0x383   : > { %652 = vst.msk [vmem:[%s1730_s21] sm:$0xff] %vm651_vm15, %v575_v6  ;;  %v587_v10 = vcvt.f32.s32 %v586_v7 }
 0x385   : > { %v590_v11 = vadd.s32 %v589_v8, %v587_v10 }
 0x386   : > { %v601_v12 = vpop.xlane.xlu0 %600 }
 0x387   : > { %653 = vst.msk [vmem:[%s1730_s21 + $0x8] sm:$0xff] %vm651_vm15, %v590_v11  ;;  %v602_v15 = vcvt.f32.s32 %v601_v12 }
 0x389   : > { %v605_v16 = vadd.s32 %v604_v13, %v602_v15 }
 0x38a   : > { %v616_v17 = vpop.xlane.xlu1 %615 }
 0x38b   : > { %654 = vst.msk [vmem:[%s1730_s21 + $0x10] sm:$0xff] %vm651_vm15, %v605_v16  ;;  %v617_v20 = vcvt.f32.s32 %v616_v17 }
 0x38d   : > { %v620_v22 = vadd.s32 %v619_v18, %v617_v20 }
 0x38e   : > { %v631_v23 = vpop.xlane.xlu0 %630 }
 0x38f   : > { %655 = vst.msk [vmem:[%s1730_s21 + $0x18] sm:$0xff] %vm651_vm15, %v620_v22  ;;  %v632_v25 = vcvt.f32.s32 %v631_v23  ;;  %668 = sbr.rel (!%p1618_p4) target bundleno = 979 (0x3d3), region = 44 }
 0x390   : > { %v646_v26 = vpop.xlane.xlu1 %645 }
 0x391   : > { %v635_v28 = vadd.s32 %v634_v24, %v632_v25  ;;  %v647_v29 = vcvt.f32.s32 %v646_v26 }
 0x393   : > { %656 = vst.msk [vmem:[%s1730_s21 + $0x20] sm:$0xff] %vm651_vm15, %v635_v28  ;;  %v650_v30 = vadd.s32 %v649_v27, %v647_v29 }
 0x395   : > { %657 = vst.msk [vmem:[%s1730_s21 + $0x28] sm:$0xff] %vm651_vm15, %v650_v30 }
 0x396   : > { %s1864_s26 = smov (!%p671_p8, %s670_s26), 6 }
 0x397   : > { %s1129_s9 = sshll.u32 %s1864_s26, 7 }
 0x398   : > { %p1132_p9 = scmp.eq.s32.totalorder %s1129_s9, 0 }
 0x399   : > { %1396 = sdivrem.u32 (!%p1132_p9), %s1864_s26, 6 }
 0x39a   : > { %679 = sbr.rel (%p1132_p9) target bundleno = 979 (0x3d3), region = 48 }
 0x3a2   : > { %s1757_s11 = spop.drf %1396 }
 0x3a3   : > { %p1133_p10 = scmp.le.s32.totalorder %s1757_s11, 0 }
 0x3a4   : > { %s1854_s12 = smov (!%p1133_p10), %s1751_s8  ;;  %s1855_s13 = smov (!%p1133_p10), %s1703_s23 }
 0x3a5   : > { %1028 = sbr.rel (%p1133_p10) target bundleno = 950 (0x3b6), region = 196  ;;  %s1766_s14 = smov (!%p1133_p10), 0  }
 0x3a6   : > { %s1768_s15 = smov (!%p1133_p10), 0  }
 0x3ac LB: >> { %v753_v31 = vld [vmem:[%s1498_s13] sm:$0xff]  ;;  %v755_v32 = vld [vmem:[%s1498_s13 + $0x8] sm:$0xff]  ;;  %v757_v33 = vld [vmem:[%s1498_s13 + $0x10] sm:$0xff]  ;;  %s765_s16 = sadd.s32 1, %s1502_s14  ;;  %s747_s15 = sadd.s32 1, %s1506_s15   ;;  %s1506_s15 = sphi %s1768_s15, %s747_s15   ;;  %s1502_s14 = sphi %s1766_s14, %s1856_s14   ;;  %s1498_s13 = sphi %s1855_s13, %s770_s13   ;;  %s1494_s12 = sphi %s1854_s12, %s771_s12  }
 0x3ad   : >> { %754 = vst [vmem:[%s1494_s12] sm:$0xff] %v753_v31  ;;  %756 = vst [vmem:[%s1494_s12 + $0x8] sm:$0xff] %v755_v32  ;;  %v759_v34 = vld [vmem:[%s1498_s13 + $0x18] sm:$0xff]  ;;  %v761_v35 = vld [vmem:[%s1498_s13 + $0x20] sm:$0xff]  ;;  %p766_p11 = scmp.ge.s32.totalorder %s765_s16, %s1757_s11  ;;  %p746_p12 = scmp.ge.s32.totalorder %s747_s15, %s1757_s11 }
 0x3ae   : >> { %758 = vst [vmem:[%s1494_s12 + $0x10] sm:$0xff] %v757_v33  ;;  %v763_v36 = vld [vmem:[%s1498_s13 + $0x28] sm:$0xff]  ;;  %760 = vst [vmem:[%s1494_s12 + $0x18] sm:$0xff] %v759_v34 }
 0x3af   : >> { %762 = vst [vmem:[%s1494_s12 + $0x20] sm:$0xff] %v761_v35  ;;  %764 = vst [vmem:[%s1494_s12 + $0x28] sm:$0xff] %v763_v36  ;;  %s1866_s16 = smov (%p766_p11, %s765_s16), 0  ;;  %749 = sbr.rel (!%p746_p12) target bundleno = 940 (0x3ac), region = 202 }
 0x3b0   : >> { %s768_s17 = smul.u32 48, %s1866_s16  ;;  %s1856_s14 = smov %s1866_s16 }
 0x3b2   : >> { %s770_s13 = scalar_lea.vmem %s1703_s23, %s768_s17 [#allocation2]   ;;  %s771_s12 = scalar_lea.vmem %s1751_s8, %s768_s17  }
 0x3b6 PF: > { %1398 = sdivrem.u32 %s1864_s26, 6 }
 0x3b7   : > { %s1134_s18 = smul.u32 48, %s1757_s11 }
 0x3b9   : > { %s776_s19 = scalar_lea.vmem %s1703_s23, %s1134_s18 [#allocation2]   ;;  %s778_s20 = scalar_lea.vmem %s1751_s8, %s1134_s18  }
 0x3bf   : > { %s1399_s27 = spop.drf %1398 }
 0x3c0   : > { %p1136_p13 = scmp.le.s32.totalorder %s1399_s27, 0 }
 0x3c1   : > { %s1508_s30 = smov (!%p1136_p13), %s778_s20   ;;  %s1512_s7 = smov (!%p1136_p13), %s776_s19  }
 0x3c2   : > { %1042 = sbr.rel (%p1136_p13) target bundleno = 979 (0x3d3), region = 207  ;;  %s1516_s9 = smov (!%p1136_p13), 0  }
 0x3c3   : > { %s1520_s17 = smov (!%p1136_p13), 0  }
 0x3c9 LB: >> { %v788_v37 = vld [vmem:[%s1514_s7] sm:$0xff]  ;;  %s790_s12 = sadd.s32 1, %s1518_s9  ;;  %s782_s17 = sadd.s32 1, %s1522_s17   ;;  %s1522_s17 = sphi %s1520_s17, %s782_s17   ;;  %s1518_s9 = sphi %s1516_s9, %s1517_s9   ;;  %s1514_s7 = sphi %s1512_s7, %s795_s7   ;;  %s1510_s30 = sphi %s1508_s30, %s796_s30  }
 0x3ca   : >> { %789 = vst [vmem:[%s1510_s30] sm:$0xff] %v788_v37  ;;  %p791_p0 = scmp.ge.s32.totalorder %s790_s12, %s1399_s27  ;;  %p781_p1 = scmp.ge.s32.totalorder %s782_s17, %s1399_s27 }
 0x3cc   : >> { %s1868_s12 = smov (%p791_p0, %s790_s12), 0  ;;  %784 = sbr.rel (!%p781_p1) target bundleno = 969 (0x3c9), region = 213 }
 0x3cd   : >> { %s1137_s23 = sshll.u32 %s1868_s12, 3  ;;  %s1517_s9 = smov %s1868_s12  }
 0x3ce   : >> { %s795_s7 = scalar_lea.vmem %s776_s19, %s1137_s23 [#allocation2]   ;;  %s796_s30 = scalar_lea.vmem %s778_s20, %s1137_s23  }
 0x3d3 PF: > { %802 = sbr.rel (!%p1618_p4) target bundleno = 1047 (0x417), region = 96  ;;  %s804_s26 = ssub.s32 (%p1618_p4), 11, %s1633_s10 }
 0x3d4   : > { %s1152_s8 = smul.u32 (%p1618_p4), 48, %s1606_s24  ;;  %p805_p2 = scmp.lt.s32.totalorder (%p1618_p4), %s804_s26, 6 }
 0x3d6   : > { %s1797_s14 = scalar_lea.vmem (%p1618_p4), %s1852_s6, %s1152_s8  }
 0x3da   : > { %s1870_s26 = smov (!%p805_p2, %s804_s26), 6 }
 0x3db   : > { %s1139_s15 = sshll.u32 %s1870_s26, 7 }
 0x3dc   : > { %p1142_p3 = scmp.eq.s32.totalorder %s1139_s15, 0 }
 0x3dd   : > { %1400 = sdivrem.u32 (!%p1142_p3), %s1870_s26, 6 }
 0x3de   : > { %813 = sbr.rel (%p1142_p3) target bundleno = 1047 (0x417), region = 100 }
 0x3e6   : > { %s1803_s29 = spop.drf %1400 }
 0x3e7   : > { %p1143_p4 = scmp.le.s32.totalorder %s1803_s29, 0 }
 0x3e8   : > { %s1857_s24 = smov (!%p1143_p4), %s1797_s14  ;;  %s1858_s10 = smov (!%p1143_p4), %s1730_s21 }
 0x3e9   : > { %1056 = sbr.rel (%p1143_p4) target bundleno = 1018 (0x3fa), region = 218  ;;  %s1812_s16 = smov (!%p1143_p4), 0  }
 0x3ea   : > { %s1814_s18 = smov (!%p1143_p4), 0  }
 0x3f0 LB: >> { %v887_v38 = vld [vmem:[%s1530_s10] sm:$0xff]  ;;  %v889_v39 = vld [vmem:[%s1530_s10 + $0x8] sm:$0xff]  ;;  %v891_v40 = vld [vmem:[%s1530_s10 + $0x10] sm:$0xff]  ;;  %s899_s19 = sadd.s32 1, %s1534_s16  ;;  %s881_s18 = sadd.s32 1, %s1538_s18   ;;  %s1538_s18 = sphi %s1814_s18, %s881_s18   ;;  %s1534_s16 = sphi %s1812_s16, %s1859_s16   ;;  %s1530_s10 = sphi %s1858_s10, %s904_s10   ;;  %s1526_s24 = sphi %s1857_s24, %s905_s24  }
 0x3f1   : >> { %888 = vst [vmem:[%s1526_s24] sm:$0xff] %v887_v38  ;;  %890 = vst [vmem:[%s1526_s24 + $0x8] sm:$0xff] %v889_v39  ;;  %v893_v41 = vld [vmem:[%s1530_s10 + $0x18] sm:$0xff]  ;;  %v895_v42 = vld [vmem:[%s1530_s10 + $0x20] sm:$0xff]  ;;  %p900_p5 = scmp.ge.s32.totalorder %s899_s19, %s1803_s29  ;;  %p880_p6 = scmp.ge.s32.totalorder %s881_s18, %s1803_s29 }
 0x3f2   : >> { %892 = vst [vmem:[%s1526_s24 + $0x10] sm:$0xff] %v891_v40  ;;  %v897_v43 = vld [vmem:[%s1530_s10 + $0x28] sm:$0xff]  ;;  %894 = vst [vmem:[%s1526_s24 + $0x18] sm:$0xff] %v893_v41 }
 0x3f3   : >> { %896 = vst [vmem:[%s1526_s24 + $0x20] sm:$0xff] %v895_v42  ;;  %898 = vst [vmem:[%s1526_s24 + $0x28] sm:$0xff] %v897_v43  ;;  %s1872_s19 = smov (%p900_p5, %s899_s19), 0  ;;  %883 = sbr.rel (!%p880_p6) target bundleno = 1008 (0x3f0), region = 224 }
 0x3f4   : >> { %s902_s20 = smul.u32 48, %s1872_s19  ;;  %s1859_s16 = smov %s1872_s19 }
 0x3f6   : >> { %s904_s10 = scalar_lea.vmem %s1730_s21, %s902_s20 [#allocation3]   ;;  %s905_s24 = scalar_lea.vmem %s1797_s14, %s902_s20  }
 0x3fa PF: > { %1402 = sdivrem.u32 %s1870_s26, 6 }
 0x3fb   : > { %s1144_s27 = smul.u32 48, %s1803_s29 }
 0x3fd   : > { %s910_s30 = scalar_lea.vmem %s1730_s21, %s1144_s27 [#allocation3]   ;;  %s912_s7 = scalar_lea.vmem %s1797_s14, %s1144_s27  }
 0x403   : > { %s1403_s9 = spop.drf %1402 }
 0x404   : > { %p1146_p7 = scmp.le.s32.totalorder %s1403_s9, 0 }
 0x405   : > { %s1540_s17 = smov (!%p1146_p7), %s912_s7   ;;  %s1544_s12 = smov (!%p1146_p7), %s910_s30  }
 0x406   : > { %1070 = sbr.rel (%p1146_p7) target bundleno = 1047 (0x417), region = 229  ;;  %s1548_s23 = smov (!%p1146_p7), 0  }
 0x407   : > { %s1552_s8 = smov (!%p1146_p7), 0  }
 0x40d LB: >> { %v922_v44 = vld [vmem:[%s1546_s12] sm:$0xff]  ;;  %s924_s11 = sadd.s32 1, %s1550_s23  ;;  %s916_s8 = sadd.s32 1, %s1554_s8   ;;  %s1554_s8 = sphi %s1552_s8, %s916_s8   ;;  %s1550_s23 = sphi %s1548_s23, %s1549_s23   ;;  %s1546_s12 = sphi %s1544_s12, %s929_s12   ;;  %s1542_s17 = sphi %s1540_s17, %s930_s17  }
 0x40e   : >> { %923 = vst [vmem:[%s1542_s17] sm:$0xff] %v922_v44  ;;  %p925_p8 = scmp.ge.s32.totalorder %s924_s11, %s1403_s9  ;;  %p915_p9 = scmp.ge.s32.totalorder %s916_s8, %s1403_s9 }
 0x410   : >> { %s1874_s11 = smov (%p925_p8, %s924_s11), 0  ;;  %918 = sbr.rel (!%p915_p9) target bundleno = 1037 (0x40d), region = 235 }
 0x411   : >> { %s1147_s21 = sshll.u32 %s1874_s11, 3  ;;  %s1549_s23 = smov %s1874_s11  }
 0x412   : >> { %s929_s12 = scalar_lea.vmem %s910_s30, %s1147_s21 [#allocation3]   ;;  %s930_s17 = scalar_lea.vmem %s912_s7, %s1147_s21  }
 0x417 PF: > { %p14_p10 = scmp.ge.s32.totalorder %s1608_s25, 4   ;;  %s1860_s21 = smov %s1486_s22 }
 0x418   : > { %s1861_s22 = smov %s1616_s28  ;;  %s1862_s23 = smov %s1608_s25 }
 0x419   :  { %16 = sbr.rel (!%p14_p10) target bundleno = 2 (0x2), region = 246 }

</bundles_post_ra>
